<compile_context>
chip_gen: v6e
topology: v6e:2x2x1
jax: 0.10.0
libtpu: 0.0.40
codegen_flags: <defaults>
</compile_context>

<pallas_src>
import jax
import jax.numpy as jnp
from jax.experimental import pallas as pl
from jax.experimental.pallas import tpu as pltpu


def _log_kernel(x_ref, o_ref):
    # Compute in f32 on the EUP and cast back to the I/O dtype. At the HBM
    # roofline the transcendental rate has huge headroom, so this is free and
    # keeps the lowering uniform across f32/bf16 and TPU generations.
    o_ref[...] = jnp.log(x_ref[...].astype(jnp.float32)).astype(o_ref.dtype)


def _sublane_multiple(itemsize: int) -> int:
    # Sub-32-bit dtypes pack along sublanes: a vreg holds (8,128) f32,
    # (16,128) bf16, (32,128) int8/fp8.
    return {4: 8, 2: 16, 1: 32}.get(itemsize, 8)


def _block_budget():
    """(target block bytes, vmem_limit_bytes), tuned per TPU generation."""
    kind = ""
    try:
        kind = jax.devices()[0].device_kind.lower()
    except Exception:
        pass
    if "v5" in kind or "v6" in kind:
        # 128 MiB physical VMEM: 8 MiB blocks; double-buffered in+out ~= 32 MiB.
        return 8 * 1024 * 1024, 64 * 1024 * 1024
    # v7x has only 64 MiB VMEM per TensorCore (and ~2.3x the HBM BW, so per-step
    # DMA time is already short at 4 MiB). Unknown chips get the same safe budget.
    return 4 * 1024 * 1024, 32 * 1024 * 1024


def _round_up(a: int, m: int) -> int:
    return ((a + m - 1) // m) * m


def pallas_log_supported(x) -> bool:
    """Shapes that map to the kernel with zero extra HBM passes.

    Other shapes (trailing dim not a multiple of 128, 0-D/1-D, empty) dispatch
    to jnp.log in the wrapper: forcing them through the kernel would require a
    relayout/pad copy that costs more HBM traffic than the kernel saves.
    """
    return x.ndim >= 2 and x.shape[-1] % 128 == 0 and x.size > 0


def _pallas_log(x, *, target_block_bytes=None, vmem_limit_bytes=None):
    """Elementwise natural log via Pallas. Requires pallas_log_supported(x)."""
    orig_shape, dtype = x.shape, x.dtype
    itemsize = jnp.dtype(dtype).itemsize
    sub = _sublane_multiple(itemsize)

    tgt, vmem_limit = _block_budget()
    if target_block_bytes is not None:
        tgt = int(target_block_bytes)
    if vmem_limit_bytes is not None:
        vmem_limit = int(vmem_limit_bytes)

    cols = orig_shape[-1]
    rows = x.size // cols
    # Collapse leading dims only: no minor-dim change -> free reshape, no
    # relayout copy. This (and the inverse below) is the only wrapper-side
    # data movement.
    x2d = x.reshape(rows, cols)

    # Lane-dense column blocks (multiple of 128), capped so even a
    # minimum-height block stays within the byte budget.
    max_bcols = max(128, (tgt // (sub * itemsize)) // 128 * 128)
    block_cols = min(cols, max_bcols)

    # Row blocks: as tall as the byte budget allows, rounded to the sublane
    # packing multiple, never taller than the tile-padded row count.
    rows_padded = _round_up(rows, sub)
    block_rows = max(sub, (tgt // (block_cols * itemsize)) // sub * sub)
    block_rows = min(block_rows, rows_padded)

    # Partial boundary blocks (ragged rows/cols) are masked by Pallas — no
    # padded temporaries are ever materialized.
    grid = (pl.cdiv(rows, block_rows), pl.cdiv(cols, block_cols))

    out2d = pl.pallas_call(
        _log_kernel,
        out_shape=jax.ShapeDtypeStruct((rows, cols), dtype),
        grid=grid,
        in_specs=[pl.BlockSpec((block_rows, block_cols), lambda i, j: (i, j))],
        out_specs=pl.BlockSpec((block_rows, block_cols), lambda i, j: (i, j)),
        # No input_output_aliases: without caller donation it would force a
        # defensive full copy of the input before the call.
        compiler_params=pltpu.CompilerParams(
            dimension_semantics=("parallel", "parallel"),
            vmem_limit_bytes=vmem_limit,
        ),
        cost_estimate=pl.CostEstimate(
            flops=0,
            transcendentals=rows * cols,
            bytes_accessed=2 * rows * cols * itemsize,
        ),
    )(x2d)

    # Expanding leading dims back is again a free (minor-dim-preserving) reshape.
    return out2d.reshape(orig_shape)


def normalize_log_scaling(x, key, probability: float = 1.0,
                          min_pallas_bytes: int = 1 << 20):
    """JAX/Pallas equivalent of NormalizeLogScaling.forward.

    Applies elementwise log with the given probability (gate drawn from a
    uniform, matching `probability > torch.rand(1)`). Tensors that are small or
    whose trailing dim is not lane-aligned use XLA's fused jnp.log directly
    (kernel-launch / relayout overhead would dominate); everything else uses
    the HBM-roofline-tuned Pallas kernel.
    """
    u = jax.random.uniform(key, ())  # analogue of torch.rand(1)
    use_pallas = (pallas_log_supported(x)
                  and x.size * jnp.dtype(x.dtype).itemsize >= min_pallas_bytes)
    log_fn = _pallas_log if use_pallas else jnp.log
    return jax.lax.cond(probability > u, log_fn, lambda v: v, x)


if __name__ == "__main__":
    root = jax.random.PRNGKey(0)
    k_x, k_gate, k_x2, k_x3 = jax.random.split(root, 4)

    # Module-shaped input: (batch, channels, time) with a lane-friendly time dim.
    B, C, T = 2, 4, 256
    x = jax.random.uniform(k_x, (B, C, T), jnp.float32, minval=0.1, maxval=2.0)
    ref = jnp.log(x)

    # 1) Kernel directly (single-block, fully lane-dense path).
    out = jax.block_until_ready(_pallas_log(x))
    assert out.shape == x.shape and out.dtype == x.dtype
    assert jnp.allclose(out, ref, atol=1e-6, rtol=1e-6)

    # 2) Multi-block grid with partial (masked) boundary blocks on BOTH axes:
    #    37 rows x 384 lanes with a tiny forced block budget -> blocks (8, 256),
    #    grid (cdiv(37,8), cdiv(384,256)) = (5, 2). No padding copies involved.
    x_ragged = jax.random.uniform(k_x2, (37, 384), jnp.float32,
                                  minval=0.1, maxval=3.0)
    out_r = jax.block_until_ready(
        _pallas_log(x_ragged, target_block_bytes=8 * 256 * 4))
    assert jnp.allclose(out_r, jnp.log(x_ragged), atol=1e-6, rtol=1e-6)

    # 3) bf16 path (16-row sublane packing multiple, byte-sized blocks).
    x_bf = jax.random.uniform(k_x3, (2, 24, 128), jnp.bfloat16,
                              minval=0.5, maxval=2.0)
    out_bf = jax.block_until_ready(_pallas_log(x_bf))
    assert out_bf.shape == x_bf.shape and out_bf.dtype == jnp.bfloat16
    assert jnp.allclose(out_bf.astype(jnp.float32),
                        jnp.log(x_bf).astype(jnp.float32),
                        atol=3e-2, rtol=3e-2)

    # 4) Full module semantics: probability=1.0 always applies log (Pallas path
    #    forced even at this small size); probability=0.0 is the identity.
    out_p1 = jax.block_until_ready(
        normalize_log_scaling(x, k_gate, probability=1.0, min_pallas_bytes=0))
    assert jnp.allclose(out_p1, ref, atol=1e-6, rtol=1e-6)
    out_p0 = jax.block_until_ready(
        normalize_log_scaling(x, k_gate, probability=0.0, min_pallas_bytes=0))
    assert jnp.allclose(out_p0, x)

    print("KERNEL_OK")
</pallas_src>

<mosaic_0001>
module attributes {stable_mosaic.version = 11 : i64} {
  func.func @_log_kernel(%arg0: i32, %arg1: i32, %arg2: memref<8x256xf32, #tpu.memory_space<vmem>>, %arg3: memref<8x256xf32, #tpu.memory_space<vmem>>) attributes {dimension_semantics = [#tpu.dimension_semantics<parallel>, #tpu.dimension_semantics<parallel>], iteration_bounds = array<i64: 1, 1>, scalar_prefetch = 0 : i64, scratch_operands = 0 : i64, tpu.core_type = #tpu.core_type<tc>, window_params = [{transform_indices = @transform_0, window_bounds = array<i64: 8, 256>}, {transform_indices = @transform_1, window_bounds = array<i64: 8, 256>}]} {
    %c0 = arith.constant 0 : index
    %c0_0 = arith.constant 0 : index
    %0 = vector.load %arg2[%c0, %c0_0] : memref<8x256xf32, #tpu.memory_space<vmem>>, vector<8x256xf32>
    %1 = math.log %0 : vector<8x256xf32>
    %c0_1 = arith.constant 0 : index
    %c0_2 = arith.constant 0 : index
    %2 = vector.load %arg3[%c0_1, %c0_2] : memref<8x256xf32, #tpu.memory_space<vmem>>, vector<8x256xf32>
    tpu.vector_store %arg3[%c0_1, %c0_2], %1 {strides = array<i32>} : memref<8x256xf32, #tpu.memory_space<vmem>>, vector<8x256xf32>,
    return
  }
  func.func @transform_0(%arg0: i32, %arg1: i32) -> (i32, i32) {
    %c0_i32 = arith.constant 0 : i32
    return %arg0, %arg1 : i32, i32
  }
  func.func @transform_1(%arg0: i32, %arg1: i32) -> (i32, i32) {
    %c0_i32 = arith.constant 0 : i32
    return %arg0, %arg1 : i32, i32
  }
}

</mosaic_0001>

<bundles_post_ra>
// kernel: tpu_custom_call.1
= control target key start
LH: loop header
LB: loop body
LE: loop exit
PB: predicated region body
PF: predicated region fallthrough
CT: control target
= control target key end

     0   :  { %6 = vsyncpa [#allocation3], 0  ;;  %s112_s0 = inlined_call_operand.hbm [shape: f32[8,256], index: 0, kind: input, shape index: {}]   ;;  %s113_s1 = inlined_call_operand.hbm [shape: f32[8,256], index: 1, kind: output, shape index: {}]  }
   0x1   :  { %7 = vsyncpa [#allocation4], 0  ;;  %s94_s6 = smov [#allocation2]  }
   0x2   :  { %s14_s7 = sshll.u32 %s94_s6, 4  ;;  %s15_s7 = int_to_ptr.vmem [resolvable:$true] %s14_s7 }
   0x3   :  { %s58_s8 = scalar_lea.vmem %s15_s7, 256  ;;  %p63_p1 = scmp.lt.s32.totalorder %s15_s7, %s15_s7 }
   0x4   :  { %p59_p0 = scmp.ne.s32.totalorder %s15_s7, %s58_s8  ;;  %p64_p2 = scmp.lt.s32.totalorder %s58_s8, %s58_s8 }
   0x6   :  { %p65_p3 = por %p64_p2, %p63_p1 }
   0x8   :  { %p66_p4 = pnand %p65_p3, %p59_p0 }
   0xa   :  { %69 = shalt.err (!%p66_p4)
}
   0xb   :  { %17 = dma.hbm_to_vmem [thread:$0]  %s112_s0, 256, %s15_s7, [#allocation3]  }
   0xc   :  { %90 = dma.done.wait [#allocation3], 256  }
   0xd   :  { %91 = vsyncadd [#allocation3], 4294967040  ;;  %v21_v0 = vld [vmem:[#allocation2] sm:$0xff]  ;;  %v22_v1 = vld [vmem:[#allocation2 + $0x8] sm:$0xff]  ;;  %s95_s11 = smov [#allocation5]  }
   0xe   :  { %46 = vlog2.f32 %v21_v0  ;;  %s35_s12 = sshll.u32 %s95_s11, 4  ;;  %s36_s12 = int_to_ptr.vmem [resolvable:$true] %s35_s12 }
   0xf   :  { %48 = vlog2.f32 %v22_v1  ;;  %s70_s13 = scalar_lea.vmem %s36_s12, 256  ;;  %p75_p6 = scmp.lt.s32.totalorder %s36_s12, %s36_s12 }
  0x10   :  { %p71_p5 = scmp.ne.s32.totalorder %s36_s12, %s70_s13  ;;  %p76_p7 = scmp.lt.s32.totalorder %s70_s13, %s70_s13 }
  0x12   :  { %p77_p8 = por %p76_p7, %p75_p6 }
  0x14   :  { %p78_p9 = pnand %p77_p8, %p71_p5 }
  0x1b   :  { %v47_v2 = vpop.eup %46 }
  0x1c   :  { %v49_v3 = vpop.eup %48  ;;  %v24_v4 = vmul.f32 0.6931472, %v47_v2 }
  0x1d   :  { %v26_v5 = vmul.f32 0.6931472, %v49_v3 }
  0x1e   :  { %27 = vst [vmem:[#allocation5] sm:$0xff] %v24_v4 }
  0x1f   :  { %28 = vst [vmem:[#allocation5 + $0x8] sm:$0xff] %v26_v5 }
  0x20   :  { %81 = shalt.err (!%p78_p9)
}
  0x21   :  { %38 = dma.vmem_to_hbm [thread:$0]  %s36_s12, 256, %s113_s1, [#allocation4]  }
  0x22   :  { %92 = dma.done.wait [#allocation4], 256  }
  0x23   :  { %93 = vsyncadd [#allocation4], 4294967040 }
  0x24   :  { %42 = vsyncpa [#allocation3], 1 }
  0x25   :  { %43 = vsyncpa [#allocation4], 1 }

</bundles_post_ra>
